<compile_context>
chip_gen: v5e
topology: v5e:2x2
jax: 0.10.0
libtpu: 0.0.40
codegen_flags: <defaults>
</compile_context>

<pallas_src>
import math
import functools

import jax
import jax.numpy as jnp
from jax import lax
from jax.experimental import pallas as pl
from jax.experimental.pallas import tpu as pltpu


_SQRT_2_OVER_PI = math.sqrt(2.0 / math.pi)


def _cdiv(a, b):
    return -(-a // b)


def _round_up(a, b):
    return _cdiv(a, b) * b


def _gelu_tanh(x):
    # tanh-approximate GELU: tanh goes to the EUP slot (free on TPU).
    # TODO(synk): switch to the exact-erf GELU if bit-faithfulness to PyTorch's
    # default nn.GELU() is required (tanh form deviates by at most ~3e-3).
    return 0.5 * x * (1.0 + jnp.tanh(_SQRT_2_OVER_PI * (x + 0.044715 * (x * x * x))))


def _choose_lane_tile(l_out, c_in, c_out, kernel_size, stride,
                      vmem_budget_bytes=20 * 1024 * 1024, max_lanes=4096):
    """Largest lane tile (multiple of 128, <= max_lanes) whose double-buffered
    working set fits the VMEM budget (sized conservatively for v7x)."""
    halo = (kernel_size - 1) // stride

    def need(t):
        in_b = stride * c_in * (t + halo) * 2      # bf16 input tile
        out_b = c_out * t * 4                      # f32 output tile
        tmp_b = c_out * t * 4                      # f32 conv accumulator temp
        return 2 * in_b + 2 * out_b + tmp_b        # double-buffered I/O + temp

    t = max_lanes
    while t > 128 and need(t) > vmem_budget_bytes:
        t //= 2
    return min(t, _round_up(l_out, 128))


# ------------------------- Pallas kernel -------------------------

def _conv_gn_gelu_kernel(x_ref, w_ref, g_ref, beta_ref, o_ref, sum_ref, ssq_ref, *,
                         n_offsets, lane_tile, l_out, eps):
    """One (batch, pass, L-tile) grid step.

    x_ref:    (S*C_in, T + halo) bf16  phase-split input tile (+halo columns)
    w_ref:    (n_offsets, C_out, S*C_in) bf16 phase-major folded conv weight
    g_ref:    (C_out, 1) f32   GroupNorm gamma
    beta_ref: (C_out, 1) f32   GroupNorm beta
    o_ref:    (C_out, T)       output tile (PyTorch NCL layout, lane-dense)
    sum_ref / ssq_ref: (C_out, 1) f32 per-channel statistics carried in scratch
    """
    p = pl.program_id(1)        # 0: statistics pass, 1: normalize/store pass
    l = pl.program_id(2)        # L_out tile index
    T = lane_tile

    # ---- conv tile: ceil(K/S) shallow bf16 contractions, accumulated in f32 ----
    xv = x_ref[...]
    y = None
    for d in range(n_offsets):
        yd = jnp.dot(w_ref[d], xv[:, d:d + T], preferred_element_type=jnp.float32)
        y = yd if y is None else y + yd                      # (C_out, T) f32

    @pl.when((p == 0) & (l == 0))
    def _():
        sum_ref[...] = jnp.zeros_like(sum_ref)
        ssq_ref[...] = jnp.zeros_like(ssq_ref)

    @pl.when(p == 0)
    def _():
        # Tiles are padded to the lane tile; mask positions >= true L_out out of the
        # statistics.  (Conv bias is a per-channel constant -> exactly cancelled by
        # the per-channel mean subtraction, so it is never added.)
        pos = l * T + lax.broadcasted_iota(jnp.int32, y.shape, 1)
        yv = jnp.where(pos < l_out, y, 0.0)
        sum_ref[...] += jnp.sum(yv, axis=1, keepdims=True)
        ssq_ref[...] += jnp.sum(yv * yv, axis=1, keepdims=True)

    @pl.when(p == 1)
    def _():
        inv_n = 1.0 / l_out
        mean = sum_ref[...] * inv_n                          # (C_out, 1)
        var = jnp.maximum(ssq_ref[...] * inv_n - mean * mean, 0.0)
        # Fused normalize + affine: one y*a + b pass.
        a = g_ref[...] * lax.rsqrt(var + eps)
        b = beta_ref[...] - mean * a
        o_ref[...] = _gelu_tanh(y * a + b).astype(o_ref.dtype)


# ------------------------- wrapper -------------------------

def group_norm_conv_layer(hidden_states, weight, gamma, beta, bias=None, *,
                          stride, lane_tile=None, out_dtype=jnp.float32, eps=1e-5):
    """GroupNormConvLayer.forward: Conv1d(stride, VALID) -> GroupNorm -> GELU.

    hidden_states: (B, C_in, L) f32      PyTorch NCL layout
    weight:        (C_out, C_in, K) f32  PyTorch Conv1d weight layout
    gamma, beta:   (C_out,)              GroupNorm affine parameters
    bias:          optional (C_out,) Conv1d bias.  INVARIANT: this layer uses
                   GroupNorm with num_groups == num_channels, so the per-channel
                   mean subtraction cancels any per-channel additive constant
                   exactly; the bias never changes the output and is NOT fed to the
                   kernel.  Do not reuse this kernel for a grouped GroupNorm
                   (groups < channels) or a norm-free variant.
    returns        (B, C_out, L_out) out_dtype,  L_out = (L - K)//stride + 1
    """
    B, C_in, L = hidden_states.shape
    C_out, C_in_w, K = weight.shape
    S = int(stride)
    assert C_in_w == C_in, (C_in_w, C_in)
    assert gamma.shape == (C_out,) and beta.shape == (C_out,)
    if bias is not None:
        assert bias.shape == (C_out,)     # unused: exactly cancelled by GroupNorm
    assert L >= K and S >= 1
    L_out = (L - K) // S + 1

    if lane_tile is None:
        lane_tile = _choose_lane_tile(L_out, C_in, C_out, K, S)
    T = int(lane_tile)
    assert T >= 128 and T % 128 == 0, T
    D = (K - 1) // S                       # halo (in phase/q units)
    assert T * S >= K, "lane tile too small for this kernel size"
    n_off = D + 1                          # = ceil(K / S) partial contractions
    nL = _cdiv(L_out, T)
    L_out_pad = nL * T

    # --- input prep: bf16 cast, zero pad, phase split, per-tile overlapping windows.
    # x[b, i, q*S + r] -> xm[b, r*C_in + i, q]; each tile keeps D halo columns so the
    # kernel never reads outside its block.
    # TODO(synk): this costs one extra HBM round trip of the input; for strictly
    # input-bandwidth-bound shapes fuse it into the producer (allow_input_fusion) or
    # gather the overlapping windows in-kernel with manual DMA.
    Lq_pad = (nL + 1) * T                  # one extra tile of zeros sources the last halo
    L_need = Lq_pad * S
    xb = hidden_states.astype(jnp.bfloat16)
    xb = jnp.pad(xb, ((0, 0), (0, 0), (0, L_need - L)))
    xm = jnp.transpose(xb.reshape(B, C_in, Lq_pad, S), (0, 3, 1, 2))
    xm = xm.reshape(B, S * C_in, Lq_pad)
    core = jnp.transpose(xm[:, :, :nL * T].reshape(B, S * C_in, nL, T), (0, 2, 1, 3))
    if D > 0:
        halo = xm[:, :, T:(nL + 1) * T].reshape(B, S * C_in, nL, T)[..., :D]
        xh = jnp.concatenate([core, jnp.transpose(halo, (0, 2, 1, 3))], axis=-1)
    else:
        xh = core                          # (B, nL, S*C_in, T + D)

    # --- weight prep: phase-major fold, zero-padded to a whole number of phases.
    # wd[d, c, r*C_in + i] = weight[c, i, d*S + r]   (zero for d*S + r >= K)
    w_pad = jnp.pad(weight, ((0, 0), (0, 0), (0, n_off * S - K)))
    wd = jnp.transpose(w_pad.reshape(C_out, C_in, n_off, S), (2, 0, 3, 1))
    wd = wd.reshape(n_off, C_out, S * C_in).astype(jnp.bfloat16)

    g2 = gamma.reshape(C_out, 1).astype(jnp.float32)
    b2 = beta.reshape(C_out, 1).astype(jnp.float32)

    kernel = functools.partial(_conv_gn_gelu_kernel, n_offsets=n_off,
                               lane_tile=T, l_out=L_out, eps=float(eps))

    out = pl.pallas_call(
        kernel,
        out_shape=jax.ShapeDtypeStruct((B, C_out, L_out_pad), out_dtype),
        grid=(B, 2, nL),
        in_specs=[
            pl.BlockSpec((None, None, S * C_in, T + D), lambda b, p, l: (b, l, 0, 0)),
            pl.BlockSpec((n_off, C_out, S * C_in), lambda b, p, l: (0, 0, 0)),
            pl.BlockSpec((C_out, 1), lambda b, p, l: (0, 0)),
            pl.BlockSpec((C_out, 1), lambda b, p, l: (0, 0)),
        ],
        # Pass 0 never writes the output; mapping every pass-0 step onto tile 0 keeps
        # the output buffer resident so each real tile is written back to HBM exactly
        # once (during pass 1).
        out_specs=pl.BlockSpec((None, C_out, T), lambda b, p, l: (b, 0, l * p)),
        scratch_shapes=[pltpu.VMEM((C_out, 1), jnp.float32),
                        pltpu.VMEM((C_out, 1), jnp.float32)],
        compiler_params=pltpu.CompilerParams(
            # Batch shards across TensorCores (v7x megacore); pass / L-tile axes carry
            # the statistics scratch and must stay sequential.
            dimension_semantics=("parallel", "arbitrary", "arbitrary"),
            vmem_limit_bytes=32 * 1024 * 1024,
        ),
    )(xh, wd, g2, b2)

    # TODO(synk): emit bf16 output (out_dtype=jnp.bfloat16) if the consumer tolerates
    # it -- the (B, C_out, L_out) store dominates HBM traffic for wide layers.
    return out[:, :, :L_out]


# ------------------------- pure-JAX reference (verification) -------------------------

def _reference(x, weight, bias, gamma, beta, stride, *, exact_gelu=True, eps=1e-5):
    C_out, C_in, K = weight.shape
    L = x.shape[-1]
    L_out = (L - K) // stride + 1
    y = jnp.zeros((x.shape[0], C_out, L_out), jnp.float32)
    for k in range(K):
        xs = x[:, :, k:k + (L_out - 1) * stride + 1:stride]          # (B, C_in, L_out)
        y = y + jnp.einsum("oi,bil->bol", weight[:, :, k], xs,
                           precision=lax.Precision.HIGHEST)
    y = y + bias[None, :, None]
    mean = jnp.mean(y, axis=2, keepdims=True)
    var = jnp.mean((y - mean) ** 2, axis=2, keepdims=True)
    y = (y - mean) * lax.rsqrt(var + eps) * gamma[None, :, None] + beta[None, :, None]
    if exact_gelu:
        return 0.5 * y * (1.0 + lax.erf(y / math.sqrt(2.0)))
    return _gelu_tanh(y)


# ------------------------- demo -------------------------

if __name__ == "__main__":
    # Config mirroring GroupNormConvLayer(config, layer_id=0)
    num_neuron = 4            # in channels   (config.num_neuron)
    conv_dim0 = 8             # out channels  (config.conv_dim[0])
    conv_kernel0 = 3          # config.conv_kernel[0]
    conv_stride0 = 2          # config.conv_stride[0]
    B, L = 2, 300             # batch x channel x sample; L_out = 149

    key = jax.random.PRNGKey(0)
    kx, kw, kb, kg, kbe = jax.random.split(key, 5)
    x = jax.random.normal(kx, (B, num_neuron, L), jnp.float32)
    fan_in = num_neuron * conv_kernel0
    bound = 1.0 / math.sqrt(fan_in)
    weight = jax.random.uniform(kw, (conv_dim0, num_neuron, conv_kernel0),
                                jnp.float32, -bound, bound)
    bias = jax.random.uniform(kb, (conv_dim0,), jnp.float32, -bound, bound)
    gamma = 1.0 + 0.1 * jax.random.normal(kg, (conv_dim0,), jnp.float32)
    beta = 0.1 * jax.random.normal(kbe, (conv_dim0,), jnp.float32)

    # Default run (auto lane tile -> single L tile here) and an explicitly tiled run
    # that exercises the multi-tile / halo / two-pass statistics path.
    fwd = jax.jit(functools.partial(group_norm_conv_layer, stride=conv_stride0))
    out = jax.block_until_ready(fwd(x, weight, gamma, beta, bias))
    fwd_tiled = jax.jit(functools.partial(group_norm_conv_layer, stride=conv_stride0,
                                          lane_tile=128))
    out_tiled = jax.block_until_ready(fwd_tiled(x, weight, gamma, beta, bias))

    L_out = (L - conv_kernel0) // conv_stride0 + 1
    assert out.shape == (B, conv_dim0, L_out), out.shape
    assert out_tiled.shape == out.shape

    # Tight check vs a reference that applies the same deliberate approximations
    # (bf16-rounded conv inputs, tanh GELU) -- isolates genuine kernel bugs.
    xb16 = x.astype(jnp.bfloat16).astype(jnp.float32)
    wb16 = weight.astype(jnp.bfloat16).astype(jnp.float32)
    ref_bf16 = _reference(xb16, wb16, bias, gamma, beta, conv_stride0, exact_gelu=False)
    err_tight = float(jnp.max(jnp.abs(out - ref_bf16)))
    # Loose check vs the PyTorch-faithful exact f32 / erf-GELU reference: bounds the
    # deliberate bf16-MXU + tanh-GELU deviation (documented, not silent).
    ref_exact = _reference(x, weight, bias, gamma, beta, conv_stride0, exact_gelu=True)
    err_loose = float(jnp.max(jnp.abs(out - ref_exact)))
    err_tiled = float(jnp.max(jnp.abs(out_tiled - out)))

    assert err_tight < 5e-3, ("kernel mismatch vs bf16-consistent reference", err_tight)
    assert err_loose < 1e-1, ("deviation vs exact f32 reference too large", err_loose)
    assert err_tiled < 5e-3, ("tiled vs untiled mismatch", err_tiled)
    print("KERNEL_OK")
</pallas_src>

<mosaic_0001>
module attributes {stable_mosaic.version = 11 : i64} {
  func.func @_conv_gn_gelu_kernel(%arg0: i32, %arg1: i32, %arg2: i32, %arg3: memref<1x1x8x257xbf16, #tpu.memory_space<vmem>>, %arg4: memref<2x8x8xbf16, #tpu.memory_space<vmem>>, %arg5: memref<8x1xf32, #tpu.memory_space<vmem>>, %arg6: memref<8x1xf32, #tpu.memory_space<vmem>>, %arg7: memref<1x8x256xf32, #tpu.memory_space<vmem>>, %arg8: memref<8x1xf32, #tpu.memory_space<vmem>>, %arg9: memref<8x1xf32, #tpu.memory_space<vmem>>) attributes {dimension_semantics = [#tpu.dimension_semantics<parallel>, #tpu.dimension_semantics<arbitrary>, #tpu.dimension_semantics<arbitrary>], iteration_bounds = array<i64: 2, 2, 1>, scalar_prefetch = 0 : i64, scratch_operands = 2 : i64, tpu.core_type = #tpu.core_type<tc>, window_params = [{transform_indices = @transform_0, window_bounds = array<i64: 1, 1, 8, 257>}, {pipeline_mode = #tpu.pipeline_mode<synchronous>, transform_indices = @transform_1, window_bounds = array<i64: 2, 8, 8>}, {pipeline_mode = #tpu.pipeline_mode<synchronous>, transform_indices = @transform_2, window_bounds = array<i64: 8, 1>}, {pipeline_mode = #tpu.pipeline_mode<synchronous>, transform_indices = @transform_3, window_bounds = array<i64: 8, 1>}, {transform_indices = @transform_4, window_bounds = array<i64: 1, 8, 256>}]} {
    %c0 = arith.constant 0 : index
    %c0_0 = arith.constant 0 : index
    %c0_1 = arith.constant 0 : index
    %c0_2 = arith.constant 0 : index
    %0 = vector.load %arg3[%c0, %c0_0, %c0_1, %c0_2] : memref<1x1x8x257xbf16, #tpu.memory_space<vmem>>, vector<1x1x8x257xbf16>
    %1 = vector.shape_cast %0 : vector<1x1x8x257xbf16> to vector<8x257xbf16>
    %c0_3 = arith.constant 0 : index
    %c0_4 = arith.constant 0 : index
    %c0_5 = arith.constant 0 : index
    %2 = vector.load %arg4[%c0_3, %c0_4, %c0_5] : memref<2x8x8xbf16, #tpu.memory_space<vmem>>, vector<1x8x8xbf16>
    %3 = vector.shape_cast %2 : vector<1x8x8xbf16> to vector<8x8xbf16>
    %4 = vector.extract_strided_slice %1 {offsets = [0, 0], sizes = [8, 256], strides = [1, 1]} : vector<8x257xbf16> to vector<8x256xbf16>
    %cst = arith.constant dense<0.000000e+00> : vector<8x256xf32>
    %5 = tpu.matmul %3, %4, %cst {dimension_numbers = #tpu.dot_dimension_numbers<[1], [0], [0], [1], [0, 0, 1, 1], [], []>} : vector<8x8xbf16>, vector<8x256xbf16>, vector<8x256xf32> -> vector<8x256xf32>
    %c1 = arith.constant 1 : index
    %c0_6 = arith.constant 0 : index
    %c0_7 = arith.constant 0 : index
    %6 = vector.load %arg4[%c1, %c0_6, %c0_7] : memref<2x8x8xbf16, #tpu.memory_space<vmem>>, vector<1x8x8xbf16>
    %7 = vector.shape_cast %6 : vector<1x8x8xbf16> to vector<8x8xbf16>
    %8 = vector.extract_strided_slice %1 {offsets = [0, 1], sizes = [8, 256], strides = [1, 1]} : vector<8x257xbf16> to vector<8x256xbf16>
    %cst_8 = arith.constant dense<0.000000e+00> : vector<8x256xf32>
    %9 = tpu.matmul %7, %8, %cst_8 {dimension_numbers = #tpu.dot_dimension_numbers<[1], [0], [0], [1], [0, 0, 1, 1], [], []>} : vector<8x8xbf16>, vector<8x256xbf16>, vector<8x256xf32> -> vector<8x256xf32>
    %10 = arith.addf %5, %9 : vector<8x256xf32>
    %c0_i32 = arith.constant 0 : i32
    %11 = arith.cmpi eq, %arg1, %c0_i32 : i32
    %c0_i32_9 = arith.constant 0 : i32
    %12 = arith.cmpi eq, %arg2, %c0_i32_9 : i32
    %13 = arith.andi %11, %12 : i1
    %14 = arith.extui %13 : i1 to i32
    %c0_i32_10 = arith.constant 0 : i32
    %15 = arith.cmpi ne, %14, %c0_i32_10 : i32
    scf.if %15 {
      %cst_14 = arith.constant 0.000000e+00 : f32
      %22 = vector.broadcast %cst_14 : f32 to vector<8x1xf32>
      %c0_15 = arith.constant 0 : index
      %c0_16 = arith.constant 0 : index
      %23 = vector.load %arg8[%c0_15, %c0_16] : memref<8x1xf32, #tpu.memory_space<vmem>>, vector<8x1xf32>
      tpu.vector_store %arg8[%c0_15, %c0_16], %22 {strides = array<i32>} : memref<8x1xf32, #tpu.memory_space<vmem>>, vector<8x1xf32>,
      %cst_17 = arith.constant 0.000000e+00 : f32
      %24 = vector.broadcast %cst_17 : f32 to vector<8x1xf32>
      %c0_18 = arith.constant 0 : index
      %c0_19 = arith.constant 0 : index
      %25 = vector.load %arg9[%c0_18, %c0_19] : memref<8x1xf32, #tpu.memory_space<vmem>>, vector<8x1xf32>
      tpu.vector_store %arg9[%c0_18, %c0_19], %24 {strides = array<i32>} : memref<8x1xf32, #tpu.memory_space<vmem>>, vector<8x1xf32>,
    } else {
    }
    %c0_i32_11 = arith.constant 0 : i32
    %16 = arith.cmpi eq, %arg1, %c0_i32_11 : i32
    %17 = arith.extui %16 : i1 to i32
    %c0_i32_12 = arith.constant 0 : i32
    %18 = arith.cmpi ne, %17, %c0_i32_12 : i32
    scf.if %18 {
      %c256_i32 = arith.constant 256 : i32
      %22 = arith.muli %arg2, %c256_i32 : i32
      %23 = tpu.iota {dimensions = array<i32: 1>} : vector<8x256xi32>
      %24 = vector.broadcast %22 : i32 to vector<8x256xi32>
      %25 = arith.addi %24, %23 : vector<8x256xi32>
      %c149_i32 = arith.constant 149 : i32
      %26 = vector.broadcast %c149_i32 : i32 to vector<8x256xi32>
      %27 = arith.cmpi slt, %25, %26 : vector<8x256xi32>
      %cst_14 = arith.constant 0.000000e+00 : f32
      %28 = vector.broadcast %cst_14 : f32 to vector<8x256xf32>
      %29 = arith.select %27, %10, %28 : vector<8x256xi1>, vector<8x256xf32>
      %c0_15 = arith.constant 0 : index
      %c0_16 = arith.constant 0 : index
      %30 = vector.load %arg8[%c0_15, %c0_16] : memref<8x1xf32, #tpu.memory_space<vmem>>, vector<8x1xf32>
      %cst_17 = arith.constant dense<0.000000e+00> : vector<8xf32>
      %31 = vector.multi_reduction <add>, %29, %cst_17 [1] : vector<8x256xf32> to vector<8xf32>
      %32 = vector.shape_cast %31 : vector<8xf32> to vector<8x1xf32>
      %33 = arith.addf %30, %32 : vector<8x1xf32>
      %c0_18 = arith.constant 0 : index
      %c0_19 = arith.constant 0 : index
      %34 = vector.load %arg8[%c0_18, %c0_19] : memref<8x1xf32, #tpu.memory_space<vmem>>, vector<8x1xf32>
      tpu.vector_store %arg8[%c0_18, %c0_19], %33 {strides = array<i32>} : memref<8x1xf32, #tpu.memory_space<vmem>>, vector<8x1xf32>,
      %c0_20 = arith.constant 0 : index
      %c0_21 = arith.constant 0 : index
      %35 = vector.load %arg9[%c0_20, %c0_21] : memref<8x1xf32, #tpu.memory_space<vmem>>, vector<8x1xf32>
      %36 = arith.mulf %29, %29 : vector<8x256xf32>
      %cst_22 = arith.constant dense<0.000000e+00> : vector<8xf32>
      %37 = vector.multi_reduction <add>, %36, %cst_22 [1] : vector<8x256xf32> to vector<8xf32>
      %38 = vector.shape_cast %37 : vector<8xf32> to vector<8x1xf32>
      %39 = arith.addf %35, %38 : vector<8x1xf32>
      %c0_23 = arith.constant 0 : index
      %c0_24 = arith.constant 0 : index
      %40 = vector.load %arg9[%c0_23, %c0_24] : memref<8x1xf32, #tpu.memory_space<vmem>>, vector<8x1xf32>
      tpu.vector_store %arg9[%c0_23, %c0_24], %39 {strides = array<i32>} : memref<8x1xf32, #tpu.memory_space<vmem>>, vector<8x1xf32>,
    } else {
    }
    %c1_i32 = arith.constant 1 : i32
    %19 = arith.cmpi eq, %arg1, %c1_i32 : i32
    %20 = arith.extui %19 : i1 to i32
    %c0_i32_13 = arith.constant 0 : i32
    %21 = arith.cmpi ne, %20, %c0_i32_13 : i32
    scf.if %21 {
      %c0_14 = arith.constant 0 : index
      %c0_15 = arith.constant 0 : index
      %22 = vector.load %arg8[%c0_14, %c0_15] : memref<8x1xf32, #tpu.memory_space<vmem>>, vector<8x1xf32>
      %cst_16 = arith.constant 0.00671140943 : f32
      %23 = vector.broadcast %cst_16 : f32 to vector<8x1xf32>
      %24 = arith.mulf %22, %23 : vector<8x1xf32>
      %c0_17 = arith.constant 0 : index
      %c0_18 = arith.constant 0 : index
      %25 = vector.load %arg9[%c0_17, %c0_18] : memref<8x1xf32, #tpu.memory_space<vmem>>, vector<8x1xf32>
      %cst_19 = arith.constant 0.00671140943 : f32
      %26 = vector.broadcast %cst_19 : f32 to vector<8x1xf32>
      %27 = arith.mulf %25, %26 : vector<8x1xf32>
      %28 = arith.mulf %24, %24 : vector<8x1xf32>
      %29 = arith.subf %27, %28 : vector<8x1xf32>
      %cst_20 = arith.constant 0.000000e+00 : f32
      %30 = vector.broadcast %cst_20 : f32 to vector<8x1xf32>
      %31 = arith.maximumf %29, %30 : vector<8x1xf32>
      %c0_21 = arith.constant 0 : index
      %c0_22 = arith.constant 0 : index
      %32 = vector.load %arg5[%c0_21, %c0_22] : memref<8x1xf32, #tpu.memory_space<vmem>>, vector<8x1xf32>
      %cst_23 = arith.constant 9.99999974E-6 : f32
      %33 = vector.broadcast %cst_23 : f32 to vector<8x1xf32>
      %34 = arith.addf %31, %33 : vector<8x1xf32>
      %35 = math.rsqrt %34 : vector<8x1xf32>
      %36 = arith.mulf %32, %35 : vector<8x1xf32>
      %c0_24 = arith.constant 0 : index
      %c0_25 = arith.constant 0 : index
      %37 = vector.load %arg6[%c0_24, %c0_25] : memref<8x1xf32, #tpu.memory_space<vmem>>, vector<8x1xf32>
      %38 = arith.mulf %24, %36 : vector<8x1xf32>
      %39 = arith.subf %37, %38 : vector<8x1xf32>
      %40 = vector.broadcast %36 : vector<8x1xf32> to vector<8x256xf32>
      %41 = arith.mulf %10, %40 : vector<8x256xf32>
      %42 = vector.broadcast %39 : vector<8x1xf32> to vector<8x256xf32>
      %43 = arith.addf %41, %42 : vector<8x256xf32>
      %cst_26 = arith.constant 5.000000e-01 : f32
      %44 = vector.broadcast %cst_26 : f32 to vector<8x256xf32>
      %45 = arith.mulf %44, %43 : vector<8x256xf32>
      %46 = arith.mulf %43, %43 : vector<8x256xf32>
      %47 = arith.mulf %46, %43 : vector<8x256xf32>
      %cst_27 = arith.constant 4.471500e-02 : f32
      %48 = vector.broadcast %cst_27 : f32 to vector<8x256xf32>
      %49 = arith.mulf %48, %47 : vector<8x256xf32>
      %50 = arith.addf %43, %49 : vector<8x256xf32>
      %cst_28 = arith.constant 0.797884583 : f32
      %51 = vector.broadcast %cst_28 : f32 to vector<8x256xf32>
      %52 = arith.mulf %51, %50 : vector<8x256xf32>
      %53 = math.tanh %52 : vector<8x256xf32>
      %cst_29 = arith.constant 1.000000e+00 : f32
      %54 = vector.broadcast %cst_29 : f32 to vector<8x256xf32>
      %55 = arith.addf %54, %53 : vector<8x256xf32>
      %56 = arith.mulf %45, %55 : vector<8x256xf32>
      %c0_30 = arith.constant 0 : index
      %c0_31 = arith.constant 0 : index
      %c0_32 = arith.constant 0 : index
      %57 = vector.load %arg7[%c0_30, %c0_31, %c0_32] : memref<1x8x256xf32, #tpu.memory_space<vmem>>, vector<1x8x256xf32>
      %58 = vector.shape_cast %57 : vector<1x8x256xf32> to vector<8x256xf32>
      %59 = vector.shape_cast %56 : vector<8x256xf32> to vector<1x8x256xf32>
      tpu.vector_store %arg7[%c0_30, %c0_31, %c0_32], %59 {strides = array<i32>} : memref<1x8x256xf32, #tpu.memory_space<vmem>>, vector<1x8x256xf32>,
    } else {
    }
    return
  }
  func.func @transform_0(%arg0: i32, %arg1: i32, %arg2: i32) -> (i32, i32, i32, i32) {
    %c0_i32 = arith.constant 0 : i32
    %c0_i32_0 = arith.constant 0 : i32
    %c0_i32_1 = arith.constant 0 : i32
    return %arg0, %arg2, %c0_i32, %c0_i32_0 : i32, i32, i32, i32
  }
  func.func @transform_1(%arg0: i32, %arg1: i32, %arg2: i32) -> (i32, i32, i32) {
    %c0_i32 = arith.constant 0 : i32
    %c0_i32_0 = arith.constant 0 : i32
    %c0_i32_1 = arith.constant 0 : i32
    %c0_i32_2 = arith.constant 0 : i32
    return %c0_i32, %c0_i32_0, %c0_i32_1 : i32, i32, i32
  }
  func.func @transform_2(%arg0: i32, %arg1: i32, %arg2: i32) -> (i32, i32) {
    %c0_i32 = arith.constant 0 : i32
    %c0_i32_0 = arith.constant 0 : i32
    %c0_i32_1 = arith.constant 0 : i32
    return %c0_i32, %c0_i32_0 : i32, i32
  }
  func.func @transform_3(%arg0: i32, %arg1: i32, %arg2: i32) -> (i32, i32) {
    %c0_i32 = arith.constant 0 : i32
    %c0_i32_0 = arith.constant 0 : i32
    %c0_i32_1 = arith.constant 0 : i32
    return %c0_i32, %c0_i32_0 : i32, i32
  }
  func.func @transform_4(%arg0: i32, %arg1: i32, %arg2: i32) -> (i32, i32, i32) {
    %0 = arith.muli %arg2, %arg1 : i32
    %c0_i32 = arith.constant 0 : i32
    %c0_i32_0 = arith.constant 0 : i32
    return %arg0, %c0_i32, %0 : i32, i32, i32
  }
}

</mosaic_0001>

<bundles_post_ra>
// kernel: group_norm_conv_layer.1
= control target key start
LH: loop header
LB: loop body
LE: loop exit
PB: predicated region body
PF: predicated region fallthrough
CT: control target
= control target key end

     0   :  { %9 = vsyncpa [#allocation5], 0  ;;  %s924_s0 = inlined_call_operand.vmem [shape: bf16[2,1,8,257], index: 0, kind: input, shape index: {}]   ;;  %s925_s1 = inlined_call_operand.vmem [shape: bf16[2,8,8], index: 1, kind: input, shape index: {}]   ;;  %s926_s2 = inlined_call_operand.vmem [shape: f32[8,1], index: 2, kind: input, shape index: {}]   ;;  %s927_s3 = inlined_call_operand.vmem [shape: f32[8,1], index: 3, kind: input, shape index: {}]   ;;  %s928_s4 = inlined_call_operand.hbm [shape: f32[2,8,256], index: 4, kind: output, shape index: {}]  }
   0x1   :  { %11 = vsyncpa [#allocation5 + $0x1], 0  ;;  %s762_s15 = smov 0   ;;  %s764_s16 = smov 0  }
   0x2   :  { %s766_s17 = smov 0   ;;  %s768_s18 = smov 0  }
   0x3   :  { %s770_s19 = smov 0   ;;  %s772_s20 = smov 0  }
   0x4   :  { %s774_s21 = smov 0   ;;  %s776_s22 = smov 0  }
   0x5 LB: > { %s534_s23 = sadd.s32 4294967295, %s732_s22   ;;  %s535_s24 = sadd.s32 4294967294, %s732_s22   ;;  %s732_s22 = sphi %s776_s22, %s17_s22   ;;  %s728_s21 = sphi %s774_s21, %s937_s21   ;;  %s724_s20 = sphi %s772_s20, %s936_s20   ;;  %s720_s19 = sphi %s770_s19, %s935_s19   ;;  %s716_s18 = sphi %s768_s18, %s934_s18   ;;  %s712_s17 = sphi %s766_s17, %s933_s17   ;;  %s708_s16 = sphi %s764_s16, %s932_s16   ;;  %s704_s15 = sphi %s762_s15, %s931_s15  }
   0x6   : > { %s32_s25 = sadd.s32 1, %s724_s20  ;;  %s36_s26 = sadd.s32 1, %s728_s21 }
   0x7   : > { %p34_p0 = scmp.ge.s32.totalorder %s32_s25, 2  ;;  %p148_p1 = scmp.ne.s32.totalorder %s712_s17, %s708_s16 }
   0x8   : > { %p149_p2 = scmp.eq.s32.totalorder %s534_s23, 3  ;;  %p154_p4 = scmp.ne.s32.totalorder %s708_s16, %s704_s15 }
   0x9   : > { %s939_s25 = smov (%p34_p0, %s32_s25), 0  ;;  %s941_s26 = smov (!%p34_p0, %s36_s26), %s728_s21 }
   0xa   : > { %p811_p3 = por %p149_p2, %p148_p1  ;;  %p38_p5 = scmp.ge.s32.totalorder %s941_s26, 2 }
   0xb   : > { %p155_p6 = scmp.eq.s32.totalorder %s535_s24, 3  ;;  %p538_p7 = scmp.ge.s32.totalorder %s732_s22, 1 }
   0xc   : > { %p194_p8 = scmp.lt.s32.totalorder %s732_s22, 5  ;;  %s943_s26 = smov (%p38_p5, %s941_s26), 0 }
   0xd   : > { %p821_p9 = por %p155_p6, %p154_p4  ;;  %s133_s29 = ssub.s32 %s728_s21, %s943_s26 }
   0xe   : > { %p195_p10 = pnand %p538_p7, %p194_p8  ;;  %s138_s30 = sadd.s32 1, %s712_s17 }
   0xf   : > { %p136_p11 = scmp.eq.s32.totalorder %s133_s29, 0  ;;  %p224_p12 = scmp.lt.s32.totalorder (!%p195_p10), %s720_s19, 1 }
  0x10   : > { %198 = sbr.rel (%p195_p10) target bundleno = 638 (0x27e), region = 36  ;;  %s221_s11 = sand.u32 (!%p195_p10), 1, %s708_s16  }
  0x11   : > { %s829_s5 = scalar_select %p136_p11, %s712_s17, %s138_s30  }
  0x12   : > { %s839_s12 = sshll.u32 (!%p195_p10), %s221_s11, 4  ;;  %s734_s13 = smov (!%p195_p10), 127  }
  0x13   : > { %p330_p13 = scmp.eq.s32.totalorder (!%p195_p10), %s716_s18, 0  ;;  %s861_s30 = scalar_lea.vmem (!%p195_p10), [#allocation4], %s839_s12 }
  0x15   : > { %s225_s6 = scalar_select %p224_p12, %s720_s19, 1  ;;  %vm262_vm0 = vcmask 1043456   ;;  %v238_v10 = vld [vmem:[%s925_s1] sm:$0xf]  ;;  %vm258_vm1 = vcmask 64512   ;;  %vm255_vm2 = vcmask 1039360  }
  0x16   : > { %v541_v18 = vld [vmem:[%s925_s1 + $0x4] sm:$0xf]  ;;  %vm336_vm3 = vcmask (%p330_p13), 7168   ;;  %v735_v29 = vmov (%p330_p13), 0.0  }
  0x17   : > { %s556_s7 = smul.u32 12, %s225_s6  ;;  %337 = vst.msk [vmem:[#allocation2] sm:$0xff] (%p330_p13), %vm336_vm3, %v735_v29 }
  0x18   : > { %338 = vst.msk [vmem:[#allocation3] sm:$0xff] (%p330_p13), %vm336_vm3, %v735_v29 }
  0x19   : > { %s232_s10 = scalar_lea.vmem %s924_s0, %s556_s7 }
  0x1a   : > { %v236_v0 = vld [vmem:[%s232_s10] sm:$0xff]  ;;  %v237_v1 = vld [vmem:[%s232_s10 + $0x8] sm:$0xf] }
  0x1b   : > { %v243_v2 = vunpack.c.l.b16 %v236_v0  ;;  %v244_v3 = vunpack.c.h.b16 %v236_v0  ;;  %v245_v4 = vunpack.c.l.b16 %v237_v1 }
  0x1d   : > { %v246_v5 = vpack.c.b16 %v243_v2, %v243_v2  ;;  %v248_v6 = vpack.c.b16 %v245_v4, %v245_v4  ;;  %v247_v7 = vpack.c.b16 %v244_v3, %v244_v3 }
  0x1f   : > { %249 = vrot.lane.b32.xlu0 %v246_v5, %s734_s13  ;;  %253 = vrot.lane.b32.xlu1 %v248_v6, %s734_s13  ;;  %v299_v8 = vsel %vm262_vm0, %v246_v5, 0  ;;  %v302_v9 = vsel %vm262_vm0, %v247_v7, 0 }
  0x20   : > { %311 = vmatpush.bf16.msra.mxu2 %v299_v8  ;;  %324 = vmatpush.bf16.msra.mxu3 %v302_v9 }
  0x23   : > { %545 = vmatmul.msk.bf16.vlgmr.msra.gmra.mxu3 %vm258_vm1, %v238_v10  ;;  %544 = vmatmul.msk.bf16.vlgmr.msra.gmra.mxu2 %vm258_vm1, %v238_v10 }
  0x27   : > { %251 = vrot.lane.b32.xlu0 %v247_v7, %s734_s13 }
  0x91   : > { %v250_v11 = vpop.permute.xlu0 %249  ;;  %v254_v12 = vpop.permute.xlu1 %253 }
  0x99   : > { %v252_v13 = vpop.permute.xlu0 %251 }
  0x9a   : > { %v256_v14 = vsel %vm255_vm2, %v250_v11, %v252_v13  ;;  %v257_v15 = vsel %vm255_vm2, %v252_v13, %v254_v12 }
  0x9b   : > { %v264_v16 = vsel %vm262_vm0, %v256_v14, 0  ;;  %v267_v17 = vsel %vm262_vm0, %v257_v15, 0 }
  0x9c   : > { %276 = vmatpush.bf16.msra.mxu0 %v264_v16  ;;  %289 = vmatpush.bf16.msra.mxu1 %v267_v17 }
  0x9f   : > { %542 = vmatmul.msk.bf16.vlgmr.msra.gmra.mxu0 %vm258_vm1, %v541_v18  ;;  %543 = vmatmul.msk.bf16.vlgmr.msra.gmra.mxu1 %vm258_vm1, %v541_v18 }
  0xa6   : > { %v313_v19 = vpop.f32.mrf.mxu2  ;;  %v326_v20 = vpop.f32.mrf.mxu3 }
  0xae   : > { %v315_v21 = vpop.f32.mrf.mxu2  ;;  %v328_v22 = vpop.f32.mrf.mxu3 }
 0x11c   : > { %v278_v23 = vpop.f32.mrf.mxu0  ;;  %v291_v24 = vpop.f32.mrf.mxu1 }
 0x11d   : > { %v856_v25 = vadd.f32 %v313_v19, %v278_v23  ;;  %v858_v26 = vadd.f32 %v326_v20, %v291_v24 }
 0x120   : > { %335 = sbr.rel (!%p330_p13) target bundleno = 293 (0x125), region = 40 }
 0x124   : > { %v280_v27 = vpop.f32.mrf.mxu0  ;;  %v293_v28 = vpop.f32.mrf.mxu1 }
 0x125 PF: > { %p547_p0 = scmp.ne.s32.totalorder %s716_s18, 0 }
 0x127   : > { %341 = sbr.rel (%p547_p0) target bundleno = 437 (0x1b5), region = 44 }
 0x12c   : > { %v343_v30 = vlaneseq  ;;  %v361_v36 = vmul.f32 %v856_v25, %v856_v25  ;;  %v353_v38 = vld [vmem:[#allocation2] sm:$0xff]  ;;  %vm358_vm5 = vcmask 7168   ;;  %v360_v41 = vld [vmem:[#allocation3] sm:$0xff] }
 0x12e   : > { %v344_v31 = vand.u32 127, %v343_v30 }
 0x130   : > { %v345_v32 = vadd.s32 128, %v344_v31 }
 0x132   : > { %vm350_vm4 = vcmp.lt.s32.totalorder %v345_v32, 149 }
 0x133   : > { %v352_v33 = vsel %vm350_vm4, %v858_v26, 0.0 }
 0x134   : > { %v354_v34 = vadd.f32 %v352_v33, %v856_v25  ;;  %v362_v35 = vmul.f32 %v352_v33, %v352_v33 }
 0x136   : > { %355 = vadd.xlane.f32.xlu0 %v354_v34  ;;  %v363_v37 = vadd.f32 %v362_v35, %v361_v36 }
 0x13e   : > { %364 = vadd.xlane.f32.xlu0 %v363_v37 }
 0x1a9   : > { %v356_v39 = vpop.xlane.xlu0 %355 }
 0x1aa   : > { %v357_v40 = vadd.f32 %v356_v39, %v353_v38 }
 0x1ac   : > { %359 = vst.msk [vmem:[#allocation2] sm:$0xff] %vm358_vm5, %v357_v40 }
 0x1b1   : > { %v365_v42 = vpop.xlane.xlu0 %364 }
 0x1b2   : > { %v366_v43 = vadd.f32 %v365_v42, %v360_v41 }
 0x1b4   : > { %367 = vst.msk [vmem:[#allocation3] sm:$0xff] %vm358_vm5, %v366_v43 }
 0x1b5 PF: > { %p548_p1 = scmp.ne.s32.totalorder %s716_s18, 1 }
 0x1b7   : > { %371 = sbr.rel (%p548_p1) target bundleno = 623 (0x26f), region = 48 }
 0x1bc   : > { %v372_v44 = vld [vmem:[#allocation2] sm:$0xff]  ;;  %v374_v45 = vld [vmem:[#allocation3] sm:$0xff]  ;;  %v736_v46 = vmov 0  }
 0x1bd   : > { %631 = vset.pattern.permute.xlu0 %v736_v46  ;;  %v373_v47 = vmul.f32 0.0067114094, %v372_v44  ;;  %v375_v48 = vmul.f32 0.0067114094, %v374_v45  ;;  %v379_v58 = vld [vmem:[%s926_s2] sm:$0xff] }
 0x1be   : > { %v392_v63 = vld [vmem:[%s927_s3] sm:$0xff] }
 0x1bf   : > { %v376_v49 = vmul.f32 %v373_v47, %v373_v47 }
 0x1c1   : > { %v377_v50 = vsub.f32 %v375_v48, %v376_v49 }
 0x1c3   : > { %v378_v51 = vmax.f32 %v377_v50, 0.0 }
 0x1c5   : > { %v380_v52 = vadd.f32 1e-05, %v378_v51 }
 0x1c7   : > { %632 = vrsqrt.f32 %v380_v52  ;;  %vm387_vm6 = vweird.f32 %v380_v52 }
 0x1cd   : > { %v633_v53 = vpop.eup %632 }
 0x1ce   : > { %v382_v54 = vmul.f32 %v633_v53, %v380_v52  ;;  %vm388_vm7 = vweird.f32 %v633_v53 }
 0x1cf   : > { %vm389_vm8 = vmor %vm387_vm6, %vm388_vm7 }
 0x1d0   : > { %v383_v55 = vmul.f32 %v633_v53, %v382_v54 }
 0x1d2   : > { %v384_v56 = vmul.f32 0.5, %v383_v55 }
 0x1d4   : > { %v385_v57 = vsub.f32 1.5, %v384_v56 }
 0x1d6   : > { %v386_v59 = vmul.f32 %v633_v53, %v385_v57 }
 0x1d8   : > { %v390_v60 = vsel %vm389_vm8, %v633_v53, %v386_v59 }
 0x1d9   : > { %v391_v61 = vmul.f32 %v390_v60, %v379_v58 }
 0x1db   : > { %397 = vperm.xlu0 %631, %v391_v61   ;;  %v393_v62 = vmul.f32 %v391_v61, %v373_v47 }
 0x1dd   : > { %v394_v0 = vsub.f32 %v392_v63, %v393_v62 }
 0x1e3   : > { %404 = vperm.xlu0 %631, %v394_v0  }
 0x24d   : > { %v398_v1 = vpop.permute.xlu0 %397 }
 0x24e   : > { %v400_v2 = vmul.f32 %v398_v1, %v856_v25  ;;  %v401_v3 = vmul.f32 %v398_v1, %v858_v26 }
 0x255   : > { %v405_v4 = vpop.permute.xlu0 %404 }
 0x256   : > { %v407_v5 = vadd.f32 %v405_v4, %v400_v2  ;;  %v408_v6 = vadd.f32 %v405_v4, %v401_v3 }
 0x258   : > { %v411_v7 = vmul.f32 %v407_v5, %v407_v5  ;;  %v412_v8 = vmul.f32 %v408_v6, %v408_v6  ;;  %v409_v19 = vmul.f32 0.5, %v407_v5  ;;  %v410_v21 = vmul.f32 0.5, %v408_v6 }
 0x25a   : > { %v413_v9 = vmul.f32 %v411_v7, %v407_v5  ;;  %v414_v10 = vmul.f32 %v412_v8, %v408_v6 }
 0x25c   : > { %v415_v11 = vmul.f32 0.044715, %v413_v9  ;;  %v416_v12 = vmul.f32 0.044715, %v414_v10 }
 0x25e   : > { %v417_v13 = vadd.f32 %v415_v11, %v407_v5  ;;  %v418_v14 = vadd.f32 %v416_v12, %v408_v6 }
 0x260   : > { %v419_v15 = vmul.f32 0.7978846, %v417_v13  ;;  %v420_v16 = vmul.f32 0.7978846, %v418_v14 }
 0x262   : > { %634 = vtanh.f32 %v419_v15 }
 0x263   : > { %636 = vtanh.f32 %v420_v16 }
 0x268   : > { %v635_v17 = vpop.eup %634 }
 0x269   : > { %v637_v18 = vpop.eup %636  ;;  %v423_v20 = vadd.f32 1.0, %v635_v17 }
 0x26a   : > { %v424_v22 = vadd.f32 1.0, %v637_v18 }
 0x26b   : > { %v425_v23 = vmul.f32 %v423_v20, %v409_v19 }
 0x26c   : > { %v426_v24 = vmul.f32 %v424_v22, %v410_v21 }
 0x26d   : > { %427 = vst [vmem:[%s861_s30] sm:$0xff] %v425_v23 }
 0x26e   : > { %428 = vst [vmem:[%s861_s30 + $0x8] sm:$0xff] %v426_v24 }
 0x26f PF: > { %s555_s9 = sshll.u32 %s720_s19, 4  ;;  %s446_s14 = sshll.u32 %s861_s30, 4  ;;  %s447_s14 = int_to_ptr.vmem [resolvable:$true] %s446_s14 }
 0x270   : > { %s444_s13 = scalar_lea.hbm %s928_s4, %s555_s9  ;;  %s430_s24 = scalar_lea.sflag [#allocation5], %s221_s11 }
 0x271   : > { %s448_s23 = sshll.u32 %s444_s13, 4  ;;  %s658_s19 = scalar_lea.hbm %s928_s4, 32  ;;  %s449_s23 = int_to_ptr.hbm [resolvable:$true] %s448_s23 }
 0x272   : > { %s652_s29 = sshra.s32 %s449_s23, 4  ;;  %s653_s29 = int_to_ptr.hbm [resolvable:$true] %s652_s29 }
 0x273   : > { %s654_s18 = scalar_lea.hbm %s653_s29, 16  ;;  %p659_p6 = scmp.lt.s32.totalorder %s653_s29, %s928_s4 }
 0x274   : > { %p655_p2 = scmp.ne.s32.totalorder %s653_s29, %s654_s18  ;;  %p660_p7 = scmp.lt.s32.totalorder %s658_s19, %s654_s18 }
 0x276   : > { %p656_p4 = pnand %p655_p2, %p811_p3  ;;  %p661_p8 = por %p660_p7, %p659_p6 }
 0x278   : > { %p657_p5 = pneg %p656_p4 }
 0x27a   : > { %p662_p10 = pnand %p661_p8, %p657_p5 }
 0x27c   : > { %665 = shalt.err (!%p662_p10)
}
 0x27d   : > { %557 = dma.vmem_to_hbm [thread:$0]  (%p811_p3), %s447_s14, 256, %s449_s23, %s430_s24  }
 0x27e PF: > { %p563_p11 = scmp.ge.s32.totalorder %s732_s22, 2  ;;  %s460_s11 = sand.u32 1, %s704_s15  }
 0x27f   : > { %s461_s30 = scalar_lea.sflag [#allocation5], %s460_s11 }
 0x280   : > { %p560_p12 = pnand %p563_p11, %p821_p9 }
 0x282   : > { %p561_p13 = pneg %p560_p12 }
 0x284   : > { %699 = dma.done.wait (%p561_p13), %s461_s30, 256  }
 0x285   : > { %701 = vsyncadd (%p561_p13), %s461_s30, 4294967040  ;;  %s17_s22 = sadd.s32 1, %s732_s22   ;;  %s931_s15 = smov %s708_s16 }
 0x286   : > { %p14_p0 = scmp.ge.s32.totalorder %s17_s22, 6   ;;  %s932_s16 = smov %s712_s17 }
 0x287   : > { %s933_s17 = smov %s829_s5  ;;  %s934_s18 = smov %s724_s20 }
 0x288   : > { %s935_s19 = smov %s728_s21  ;;  %s936_s20 = smov %s939_s25 }
 0x289   : > { %s937_s21 = smov %s943_s26  ;;  %16 = sbr.rel (!%p14_p0) target bundleno = 5 (0x5), region = 84 }
 0x28e   :  { %467 = vsyncpa [#allocation5], 1 }
 0x28f   :  { %469 = vsyncpa [#allocation5 + $0x1], 1 }

</bundles_post_ra>
